<compile_context>
chip_gen: v7x
topology: tpu7x:2x2x1
jax: 0.10.0
libtpu: 0.0.40
codegen_flags: <defaults>
</compile_context>

<pallas_src>
import functools

import jax
import jax.numpy as jnp
from jax import lax
from jax.experimental import pallas as pl
from jax.experimental.pallas import tpu as pltpu

_LANES = 128
_MANTISSA_BITS = 23


def _threshold(p):
    # keep  <=>  (top 23 random bits) >= threshold   =>   P(keep) = 1 - p
    return int(round(float(p) * (1 << _MANTISSA_BITS)))


def _mc_dropout_kernel_hw(seed_ref, x_ref, o_ref, *, threshold, scale):
    """Dropout on one (block_rows, 128) tile using the TPU hardware PRNG."""
    # Independent stream per grid block (prng_seed hashes its operands).
    pltpu.prng_seed(seed_ref[0], pl.program_id(0))
    bits = pltpu.bitcast(pltpu.prng_random_bits(x_ref.shape), jnp.uint32)
    r = (bits >> jnp.uint32(32 - _MANTISSA_BITS)).astype(jnp.int32)  # in [0, 2^23)
    keep = r >= jnp.int32(threshold)
    x = x_ref[...]
    o_ref[...] = jnp.where(keep, x * jnp.asarray(scale, x_ref.dtype),
                           jnp.zeros((), x_ref.dtype))


def _mc_dropout_kernel_hash(seed_ref, x_ref, o_ref, *, threshold, scale, block_rows):
    """Fallback (non-TPU backends): stateless counter-hash dropout (lowbias32-style)."""
    i = pl.program_id(0)
    # All scalar terms folded into one per-block scalar base (scalar-unit work).
    base = (
        (i * jnp.int32(block_rows * _LANES)).astype(jnp.uint32)
        + seed_ref[0].astype(jnp.uint32) * jnp.uint32(0x9E3779B9)
        + jnp.uint32(0x85EBCA6B)  # avoid the degenerate seed=0 / index=0 cell
    )
    row = lax.broadcasted_iota(jnp.int32, x_ref.shape, 0)
    lane = lax.broadcasted_iota(jnp.int32, x_ref.shape, 1)
    h = ((row << 7) + lane).astype(jnp.uint32) + base
    # 2 mixing rounds: statistical (not cryptographic) quality is enough for dropout.
    h = h ^ (h >> jnp.uint32(16))
    h = h * jnp.uint32(0x7FEB352D)
    h = h ^ (h >> jnp.uint32(15))
    h = h * jnp.uint32(0x846CA68B)
    h = h ^ (h >> jnp.uint32(16))
    keep = (h >> jnp.uint32(32 - _MANTISSA_BITS)).astype(jnp.int32) >= jnp.int32(threshold)
    x = x_ref[...]
    o_ref[...] = jnp.where(keep, x * jnp.asarray(scale, x_ref.dtype),
                           jnp.zeros((), x_ref.dtype))


def _dropout_slab(slab, p, seed_arr, donate):
    """Run the streaming dropout kernel over a lane-dense (rows, 128) slab."""
    rows = slab.shape[0]
    itemsize = jnp.dtype(slab.dtype).itemsize

    # ~1 MiB blocks: at the ~85% HBM-roofline knee; double-buffered in+out is
    # only 4 MiB, comfortably inside every generation's default scoped VMEM.
    target_rows = max(8, (1 << 20) // (_LANES * itemsize))
    target_rows = (target_rows // 8) * 8
    # Keep >= 2 grid steps when possible so v7x's second TensorCore has work.
    if rows > 8:
        half_rows = ((pl.cdiv(rows, 2) + 7) // 8) * 8
        target_rows = min(target_rows, half_rows)
    block_rows = rows if rows <= target_rows else target_rows
    grid = pl.cdiv(rows, block_rows)

    threshold = _threshold(p)
    scale = 1.0 / (1.0 - p)

    if jax.default_backend() == "tpu":
        kernel = functools.partial(_mc_dropout_kernel_hw,
                                   threshold=threshold, scale=scale)
    else:
        # TODO(synk): non-TPU fallback only; the HW PRNG has no lowering there.
        kernel = functools.partial(_mc_dropout_kernel_hash,
                                   threshold=threshold, scale=scale,
                                   block_rows=block_rows)

    return pl.pallas_call(
        kernel,
        out_shape=jax.ShapeDtypeStruct((rows, _LANES), slab.dtype),
        grid_spec=pltpu.PrefetchScalarGridSpec(
            num_scalar_prefetch=1,
            grid=(grid,),
            in_specs=[pl.BlockSpec((block_rows, _LANES), lambda i, seed_ref: (i, 0))],
            out_specs=pl.BlockSpec((block_rows, _LANES), lambda i, seed_ref: (i, 0)),
        ),
        compiler_params=pltpu.CompilerParams(
            dimension_semantics=("parallel",),
        ),
        input_output_aliases=({1: 0} if donate else {}),
    )(seed_arr, slab)


def _tail_dropout(tail, p, seed_arr, offset):
    """< 128 trailing elements: tiny, handled with plain jnp ops (same hash)."""
    n = tail.shape[0]
    idx = jnp.arange(n, dtype=jnp.uint32) + jnp.uint32(offset % (1 << 32))
    h = (idx + seed_arr[0].astype(jnp.uint32) * jnp.uint32(0x9E3779B9)
         + jnp.uint32(0x85EBCA6B))
    h = h ^ (h >> jnp.uint32(16))
    h = h * jnp.uint32(0x7FEB352D)
    h = h ^ (h >> jnp.uint32(15))
    h = h * jnp.uint32(0x846CA68B)
    h = h ^ (h >> jnp.uint32(16))
    keep = ((h >> jnp.uint32(32 - _MANTISSA_BITS)).astype(jnp.int32)
            >= jnp.int32(_threshold(p)))
    scale = jnp.asarray(1.0 / (1.0 - p), tail.dtype)
    return jnp.where(keep, tail * scale, jnp.zeros((), tail.dtype))


def monte_carlo_dropout(x, p=0.1, seed=0, donate_input=False):
    """Dropout applied unconditionally (Monte-Carlo dropout), matching
    nn.functional.dropout(x, p=p, training=True)."""
    if p <= 0.0 or x.size == 0:
        return x
    if p >= 1.0:
        return jnp.zeros_like(x)

    orig_shape = x.shape
    n = x.size
    flat = x.reshape(-1)
    seed_arr = jnp.asarray([seed], dtype=jnp.int32)

    rem = n % _LANES
    n_full = n - rem

    parts = []
    if n_full:
        main = flat if rem == 0 else flat[:n_full]
        slab = main.reshape(n_full // _LANES, _LANES)  # lane-dense, contiguous
        out_slab = _dropout_slab(slab, p, seed_arr, donate_input and rem == 0)
        parts.append(out_slab.reshape(-1))
    if rem:
        parts.append(_tail_dropout(flat[n_full:], p, seed_arr, n_full))

    out = parts[0] if len(parts) == 1 else jnp.concatenate(parts)
    return out.reshape(orig_shape)


if __name__ == "__main__":
    key = jax.random.PRNGKey(0)
    # Small NCHW input consistent with the module's usage.
    x = jax.random.normal(key, (2, 4, 16, 16), dtype=jnp.float32)

    p = 0.1
    out = monte_carlo_dropout(x, p=p, seed=0)
    out = jax.block_until_ready(out)

    # Sanity checks: shape/dtype preserved; surviving elements scaled by
    # 1/(1-p); dropped fraction roughly p.
    assert out.shape == x.shape and out.dtype == x.dtype
    kept_mask = out != 0.0
    scale = 1.0 / (1.0 - p)
    kept_vals = jnp.where(kept_mask, out, x * scale)
    assert jnp.allclose(kept_vals, x * scale, rtol=1e-5, atol=1e-5)
    drop_frac = 1.0 - jnp.mean(kept_mask.astype(jnp.float32))
    assert 0.0 <= float(drop_frac) < 0.3, f"unexpected drop fraction {drop_frac}"

    print("KERNEL_OK")
</pallas_src>

<mosaic_0001>
module attributes {stable_mosaic.version = 11 : i64} {
  func.func @_mc_dropout_kernel_hash(%arg0: i32, %arg1: memref<1xi32, #tpu.memory_space<smem>>, %arg2: memref<8x128xf32, #tpu.memory_space<vmem>>, %arg3: memref<8x128xf32, #tpu.memory_space<vmem>>) attributes {dimension_semantics = [#tpu.dimension_semantics<parallel>], iteration_bounds = array<i64: 2>, scalar_prefetch = 1 : i64, scratch_operands = 0 : i64, tpu.core_type = #tpu.core_type<tc>, window_params = [{transform_indices = @transform_0, window_bounds = array<i64: 8, 128>}, {transform_indices = @transform_1, window_bounds = array<i64: 8, 128>}]} {
    %c1024_i32 = arith.constant 1024 : i32
    %0 = arith.muli %arg0, %c1024_i32 : i32
    %c0 = arith.constant 0 : index
    %1 = memref.load %arg1[%c0] : memref<1xi32, #tpu.memory_space<smem>>
    %c-1640531527_i32 = arith.constant -1640531527 : i32
    %2 = arith.muli %1, %c-1640531527_i32 : i32
    %3 = arith.addi %0, %2 : i32
    %c-2048144789_i32 = arith.constant -2048144789 : i32
    %4 = arith.addi %3, %c-2048144789_i32 : i32
    %5 = tpu.iota {dimensions = array<i32: 0>} : vector<8x128xi32>
    %6 = tpu.iota {dimensions = array<i32: 1>} : vector<8x128xi32>
    %c7_i32 = arith.constant 7 : i32
    %7 = vector.broadcast %c7_i32 : i32 to vector<8x128xi32>
    %8 = arith.shli %5, %7 : vector<8x128xi32>
    %9 = arith.addi %8, %6 : vector<8x128xi32>
    %10 = vector.broadcast %4 : i32 to vector<8x128xi32>
    %11 = arith.addi %9, %10 : vector<8x128xi32>
    %c16_i32 = arith.constant 16 : i32
    %12 = vector.broadcast %c16_i32 : i32 to vector<8x128xi32>
    %13 = arith.shrui %11, %12 : vector<8x128xi32>
    %14 = arith.xori %11, %13 : vector<8x128xi32>
    %c2146121005_i32 = arith.constant 2146121005 : i32
    %15 = vector.broadcast %c2146121005_i32 : i32 to vector<8x128xi32>
    %16 = arith.muli %14, %15 : vector<8x128xi32>
    %c15_i32 = arith.constant 15 : i32
    %17 = vector.broadcast %c15_i32 : i32 to vector<8x128xi32>
    %18 = arith.shrui %16, %17 : vector<8x128xi32>
    %19 = arith.xori %16, %18 : vector<8x128xi32>
    %c-2073254261_i32 = arith.constant -2073254261 : i32
    %20 = vector.broadcast %c-2073254261_i32 : i32 to vector<8x128xi32>
    %21 = arith.muli %19, %20 : vector<8x128xi32>
    %c16_i32_0 = arith.constant 16 : i32
    %22 = vector.broadcast %c16_i32_0 : i32 to vector<8x128xi32>
    %23 = arith.shrui %21, %22 : vector<8x128xi32>
    %24 = arith.xori %21, %23 : vector<8x128xi32>
    %c9_i32 = arith.constant 9 : i32
    %25 = vector.broadcast %c9_i32 : i32 to vector<8x128xi32>
    %26 = arith.shrui %24, %25 : vector<8x128xi32>
    %c838861_i32 = arith.constant 838861 : i32
    %27 = vector.broadcast %c838861_i32 : i32 to vector<8x128xi32>
    %28 = arith.cmpi sge, %26, %27 : vector<8x128xi32>
    %c0_1 = arith.constant 0 : index
    %c0_2 = arith.constant 0 : index
    %29 = vector.load %arg2[%c0_1, %c0_2] : memref<8x128xf32, #tpu.memory_space<vmem>>, vector<8x128xf32>
    %cst = arith.constant 1.11111116 : f32
    %30 = vector.broadcast %cst : f32 to vector<8x128xf32>
    %31 = arith.mulf %29, %30 : vector<8x128xf32>
    %cst_3 = arith.constant 0.000000e+00 : f32
    %32 = vector.broadcast %cst_3 : f32 to vector<8x128xf32>
    %33 = arith.select %28, %31, %32 : vector<8x128xi1>, vector<8x128xf32>
    %c0_4 = arith.constant 0 : index
    %c0_5 = arith.constant 0 : index
    %34 = vector.load %arg3[%c0_4, %c0_5] : memref<8x128xf32, #tpu.memory_space<vmem>>, vector<8x128xf32>
    tpu.vector_store %arg3[%c0_4, %c0_5], %33 {strides = array<i32>} : memref<8x128xf32, #tpu.memory_space<vmem>>, vector<8x128xf32>,
    return
  }
  func.func @transform_0(%arg0: i32, %arg1: memref<1xi32, #tpu.memory_space<smem>>) -> (i32, i32) {
    %c0_i32 = arith.constant 0 : i32
    %c0_i32_0 = arith.constant 0 : i32
    return %arg0, %c0_i32 : i32, i32
  }
  func.func @transform_1(%arg0: i32, %arg1: memref<1xi32, #tpu.memory_space<smem>>) -> (i32, i32) {
    %c0_i32 = arith.constant 0 : i32
    %c0_i32_0 = arith.constant 0 : i32
    return %arg0, %c0_i32 : i32, i32
  }
}

</mosaic_0001>

<bundles_post_ra>
// kernel: tpu_custom_call.1
= control target key start
LH: loop header
LB: loop body
LE: loop exit
PB: predicated region body
PF: predicated region fallthrough
CT: control target
= control target key end

     0   :  { %s584_s0 = inlined_call_operand.<no memory space> [shape: s32[1], index: 0, kind: input, shape index: {}]   ;;  %s585_s1 = inlined_call_operand.hbm [shape: f32[16,128], index: 1, kind: input, shape index: {}]   ;;  %s586_s2 = inlined_call_operand.hbm [shape: f32[16,128], index: 2, kind: output, shape index: {}]  }
   0x1   :  { %7 = sst [smem:[#allocation3]] %s584_s0 }
   0x2   :  { %8 = vsyncpa [#allocation5], 0 }
   0x3   :  { %10 = vsyncpa [#allocation5 + $0x1], 0 }
   0x4   :  { %11 = vsyncpa [#allocation6], 0 }
   0x5   :  { %13 = vsyncpa [#allocation6 + $0x1], 0  ;;  %s422_s11 = smov 0   ;;  %s424_s12 = smov 0  }
   0x6   :  { %s426_s13 = smov 0   ;;  %s428_s14 = smov 0  }
   0x7 LB: > { %s443_s0 = sadd.s32 4294967295, %s400_s14   ;;  %s245_s15 = sadd.s32 4294967294, %s400_s14   ;;  %s400_s14 = sphi %s428_s14, %s601_s14   ;;  %s396_s13 = sphi %s426_s13, %s600_s13   ;;  %s392_s12 = sphi %s424_s12, %s599_s12   ;;  %s388_s11 = sphi %s422_s11, %s598_s11  }
   0x8   : > { %s447_s16 = sadd.s32 1, %s400_s14   ;;  %s26_s17 = sadd.s32 1, %s396_s13 }
   0x9   : > { %s23_s18 = ssub.s32 %s400_s14, %s447_s16  ;;  %p33_p0 = scmp.ne.s32.totalorder %s396_s13, %s392_s12 }
   0xa   : > { %p24_p1 = scmp.eq.s32.totalorder %s23_s18, 0  ;;  %p34_p2 = scmp.eq.s32.totalorder %s400_s14, 0 }
   0xb   : > { %p39_p3 = scmp.ne.s32.totalorder %s392_s12, %s388_s11  ;;  %p40_p4 = scmp.eq.s32.totalorder %s443_s0, 0 }
   0xc   : > { %s459_s19 = scalar_select %p24_p1, %s396_s13, %s26_s17  }
   0xd   : > { %p461_p5 = por %p34_p2, %p33_p0  ;;  %p465_p6 = por %p40_p4, %p39_p3 }
   0xe   : > { %p63_p7 = scmp.eq.s32.totalorder %s443_s0, 1  ;;  %p69_p8 = scmp.eq.s32.totalorder %s245_s15, 1 }
   0xf   : > { %p270_p10 = scmp.lt.s32.totalorder %s400_s14, 2  ;;  %s89_s24 = sand.u32 1, %s396_s13  }
  0x10   : > { %p472_p11 = por %p63_p7, %p33_p0  ;;  %p476_p12 = por %p69_p8, %p39_p3 }
  0x11   : > { %s249_s25 = sshll.u32 %s400_s14, 7  ;;  %s248_s26 = sshll.u32 %s89_s24, 3 }
  0x12   : > { %s590_s22 = scalar_select %p472_p11, 1, 0 }
  0x13   : > { %s591_s23 = scalar_select %p476_p12, 1, 0 }
  0x14   : > { %s485_s29 = scalar_lea.hbm %s585_s1, %s249_s25  ;;  %s93_s30 = scalar_lea.vmem [#allocation4], %s248_s26 }
  0x15   : > { %s100_s3 = sshll.u32 %s93_s30, 4  ;;  %p489_p13 = pnand %p270_p10, %p461_p5  ;;  %s493_s3 = int_to_ptr.vmem [resolvable:$true] %s100_s3 }
  0x16   : > { %s90_s5 = scalar_lea.sflag [#allocation5], %s89_s24  ;;  %s304_s6 = scalar_lea.hbm %s485_s29, 128 }
  0x17   : > { %p305_p2 = scmp.ne.s32.totalorder %s485_s29, %s304_s6  ;;  %p306_p3 = pneg %p489_p13 }
  0x18   : > { %s309_s9 = scalar_lea.hbm %s585_s1, 256  ;;  %p310_p5 = scmp.lt.u32.totalorder %s485_s29, %s585_s1 }
  0x19   : > { %p307_p4 = pnand %p306_p3, %p305_p2  ;;  %p311_p8 = scmp.lt.u32.totalorder %s309_s9, %s304_s6 }
  0x1a   : > { %p313_p9 = scmp.lt.u32.totalorder %s304_s6, %s485_s29 }
  0x1b   : > { %p308_p7 = pneg %p307_p4  ;;  %p312_p10 = por %p311_p8, %p310_p5 }
  0x1d   : > { %p314_p0 = por %p313_p9, %p312_p10 }
  0x1f   : > { %p315_p1 = pnand %p314_p0, %p308_p7 }
  0x21   : > { %318 = shalt.err (!%p315_p1)
}
  0x22   : > { %s319_s17 = scalar_lea.vmem %s493_s3, 128  ;;  %s402_s18 = smov [#allocation4]  }
  0x23   : > { %p320_p2 = scmp.ne.s32.totalorder %s493_s3, %s319_s17  ;;  %s324_s20 = sshll.u32 %s402_s18, 4  ;;  %s325_s20 = int_to_ptr.vmem [resolvable:$false] %s324_s20 }
  0x24   : > { %s326_s24 = scalar_lea.vmem %s325_s20, 256  ;;  %p327_p11 = scmp.lt.s32.totalorder %s493_s3, %s325_s20 }
  0x25   : > { %p322_p4 = pnand %p320_p2, %p306_p3  ;;  %p328_p5 = scmp.lt.s32.totalorder %s326_s24, %s319_s17 }
  0x27   : > { %p323_p12 = pneg %p322_p4  ;;  %p329_p8 = por %p328_p5, %p327_p11 }
  0x29   : > { %p330_p9 = pnand %p329_p8, %p323_p12 }
  0x2b   : > { %333 = shalt.err (!%p330_p9)
}
  0x2c   : > { %265 = dma.hbm_to_vmem [thread:$0]  (!%p489_p13), %s485_s29, 128, %s493_s3, %s90_s5  }
  0x2d   : > { %p593_p0 = scmp.lt.s32.totalorder %s400_s14, 3  ;;  %p594_p1 = scmp.ge.s32.totalorder %s400_s14, 1 }
  0x2f   : > { %p106_p3 = pnand %p594_p1, %p593_p0 }
  0x30   : > { %s527_s25 = sand.u32 (!%p106_p3), 1, %s392_s12  }
  0x31   : > { %109 = sbr.rel (%p106_p3) target bundleno = 104 (0x68), region = 24  ;;  %s251_s26 = sshll.u32 (!%p106_p3), %s527_s25, 3 }
  0x32   : > { %s112_s27 = scalar_lea.sflag (!%p106_p3), [#allocation5], %s527_s25  ;;  %s115_s28 = scalar_lea.vmem (!%p106_p3), [#allocation4], %s251_s26 }
  0x38   : > { %379 = dma.done.wait (%p465_p6), %s112_s27, 128  }
  0x39   : > { %381 = vsyncadd (%p465_p6), %s112_s27, 4294967168  ;;  %v139_v0 = vlaneseq  ;;  %s135_s29 = sld [smem:[#allocation3]]  ;;  %s253_s30 = sshll.u32 %s443_s0, 10  ;;  %v157_v14 = vld [vmem:[%s115_s28] sm:$0xff] }
  0x3a   : > { %s133_s21 = scalar_lea.vmem [#allocation7], %s251_s26  ;;  %v158_v16 = vmul.f32 1.1111112, %v157_v14  ;;  %s255_s7 = sshll.u32 %s443_s0, 7 }
  0x3b   : > { %v140_v1 = vshrl.u32 %v139_v0, 7  ;;  %v142_v2 = vand.u32 127, %v139_v0  ;;  %s175_s6 = sshll.u32 %s133_s21, 4  ;;  %s542_s10 = scalar_lea.hbm %s586_s2, %s255_s7  ;;  %s537_s6 = int_to_ptr.vmem [resolvable:$true] %s175_s6 }
  0x3c   : > { %s162_s15 = scalar_lea.sflag [#allocation6], %s527_s25  ;;  %s334_s17 = scalar_lea.vmem %s537_s6, 128 }
  0x3d   : > { %v143_v3 = vshll.u32 %v140_v1, 7  ;;  %p335_p6 = scmp.ne.s32.totalorder %s537_s6, %s334_s17  ;;  %p595_p11 = scmp.ne.s32.totalorder %s590_s22, 0 }
  0x3e   : > { %s403_s0 = smov [#allocation7]  }
  0x3f   : > { %s136_s3 = smul.u32 2654435769, %s135_s29  ;;  %v144_v4 = vadd.s32 %v143_v3, %v142_v2  ;;  %p336_p12 = pnand %p335_p6, %p595_p11 }
  0x40   : > { %s338_s18 = sshll.u32 %s403_s0, 4  ;;  %s339_s18 = int_to_ptr.vmem [resolvable:$false] %s338_s18 }
  0x41   : > { %s137_s4 = sadd.s32 %s253_s30, %s136_s3  ;;  %p337_p13 = pneg %p336_p12 }
  0x42   : > { %s138_s5 = sadd.s32 2246822507, %s137_s4  ;;  %s340_s20 = scalar_lea.vmem %s339_s18, 256 }
  0x43   : > { %v145_v5 = vstv %s138_s5  ;;  %p341_p7 = scmp.lt.s32.totalorder %s537_s6, %s339_s18  ;;  %p342_p10 = scmp.lt.s32.totalorder %s340_s20, %s334_s17 }
  0x44   : > { %v146_v6 = vadd.s32 %v145_v5, %v144_v4 }
  0x45   : > { %p343_p2 = por %p342_p10, %p341_p7 }
  0x46   : > { %v147_v7 = vshrl.u32 %v146_v6, 16 }
  0x47   : > { %p344_p4 = pnand %p343_p2, %p337_p13 }
  0x48   : > { %v148_v8 = vxor.u32 %v147_v7, %v146_v6 }
  0x4a   : > { %v149_v9 = vmul.u32 2146121005, %v148_v8 }
  0x4c   : > { %v150_v10 = vshrl.u32 %v149_v9, 15 }
  0x4e   : > { %v151_v11 = vxor.u32 %v150_v10, %v149_v9 }
  0x50   : > { %v152_v12 = vmul.u32 2221713035, %v151_v11 }
  0x52   : > { %v153_v13 = vshrl.u32 %v152_v12, 16 }
  0x54   : > { %v154_v15 = vxor.u32 %v153_v13, %v152_v12 }
  0x56   : > { %v155_v17 = vshrl.u32 %v154_v15, 9 }
  0x58   : > { %vm156_vm0 = vcmp.ge.s32.totalorder %v155_v17, 838861 }
  0x59   : > { %v159_v18 = vsel %vm156_vm0, %v158_v16, 0.0 }
  0x5a   : > { %160 = vst [vmem:[%s133_s21] sm:$0xff] %v159_v18 }
  0x5b   : > { %347 = shalt.err (!%p344_p4)
}
  0x5c   : > { %s348_s24 = scalar_lea.hbm %s542_s10, 128  ;;  %s352_s27 = scalar_lea.hbm %s586_s2, 256 }
  0x5d   : > { %p349_p5 = scmp.ne.s32.totalorder %s542_s10, %s348_s24  ;;  %p353_p0 = scmp.lt.u32.totalorder %s542_s10, %s586_s2 }
  0x5e   : > { %p354_p1 = scmp.lt.u32.totalorder %s352_s27, %s348_s24  ;;  %p356_p6 = scmp.lt.u32.totalorder %s348_s24, %s542_s10 }
  0x5f   : > { %p350_p8 = pnand %p349_p5, %p595_p11 }
  0x60   : > { %p355_p3 = por %p354_p1, %p353_p0 }
  0x61   : > { %p351_p9 = pneg %p350_p8 }
  0x62   : > { %p357_p12 = por %p356_p6, %p355_p3 }
  0x64   : > { %p358_p13 = pnand %p357_p12, %p351_p9 }
  0x66   : > { %361 = shalt.err (!%p358_p13)
}
  0x67   : > { %260 = dma.vmem_to_hbm [thread:$0]  (%p595_p11), %s537_s6, 128, %s542_s10, %s162_s15  }
  0x68 PF: > { %s187_s30 = sand.u32 1, %s388_s11   ;;  %p596_p7 = scmp.ne.s32.totalorder %s591_s23, 0 }
  0x69   : > { %p597_p10 = scmp.ge.s32.totalorder %s400_s14, 2  ;;  %s188_s3 = scalar_lea.sflag [#allocation6], %s187_s30 }
  0x6b   : > { %p267_p2 = pnand %p597_p10, %p596_p7 }
  0x6d   : > { %383 = dma.done.wait (!%p267_p2), %s188_s3, 128  }
  0x6e   : > { %385 = vsyncadd (!%p267_p2), %s188_s3, 4294967168  ;;  %p16_p4 = scmp.ge.s32.totalorder %s447_s16, 4   ;;  %s598_s11 = smov %s392_s12 }
  0x6f   : > { %s599_s12 = smov %s396_s13  ;;  %s600_s13 = smov %s459_s19 }
  0x70   : > { %s601_s14 = smov %s447_s16  ;;  %18 = sbr.rel (!%p16_p4) target bundleno = 7 (0x7), region = 69 }
  0x77   :  { %193 = vsyncpa [#allocation5], 1 }
  0x78   :  { %195 = vsyncpa [#allocation5 + $0x1], 1 }
  0x79   :  { %196 = vsyncpa [#allocation6], 1 }
  0x7a   :  { %198 = vsyncpa [#allocation6 + $0x1], 1 }

</bundles_post_ra>
